<compile_context>
chip_gen: v7x
topology: tpu7x:2x2x1
jax: 0.10.0
libtpu: 0.0.40
codegen_flags: <defaults>
</compile_context>

<pallas_src>
import functools

import jax
import jax.numpy as jnp
from jax.experimental import pallas as pl
from jax.experimental.pallas import tpu as pltpu

LANE = 128      # lanes per vreg (fast axis)
SUBLANE = 8     # sublanes per f32 vreg (slow axis)


def _round_up(n: int, m: int) -> int:
    return ((n + m - 1) // m) * m


def mlp_kernel(xT_ref, w1_ref, b1_ref, w2_ref, b2_ref, w3_ref, b3_ref, o_ref,
               *, use_bf16_matmul: bool = False):
    """Fused fc1 -> relu -> fc2 -> relu -> fc3 on one batch tile.

    Transposed layout (features on sublanes, batch on lanes):
      xT_ref : (2, tile_n)      w1_ref : (H, 2)      b1_ref : (H, 1)
      w2_ref : (H, H)           b2_ref : (H, 1)
      w3_ref : (C_pad, H)       b3_ref : (C_pad, 1)  o_ref  : (C_pad, tile_n)
    """
    xT = xT_ref[...]                                    # (2, tile_n)
    w1 = w1_ref[...]                                    # (H, 2)

    # fc1 has K=2: a matmul would leave >98% of the MXU idle, so compute it on
    # the VPU as two broadcast multiply-adds (exact f32).
    h1 = w1[:, 0:1] * xT[0:1, :] + w1[:, 1:2] * xT[1:2, :] + b1_ref[...]
    h1 = jnp.maximum(h1, 0.0)                           # (H, tile_n), lane-dense

    w2 = w2_ref[...]                                    # (H, H)
    w3 = w3_ref[...]                                    # (C_pad, H)
    if use_bf16_matmul:
        # Native single-pass MXU path on v6e/v7x; accumulation stays f32.
        h1 = h1.astype(jnp.bfloat16)
        w2 = w2.astype(jnp.bfloat16)
        w3 = w3.astype(jnp.bfloat16)

    h2 = jnp.dot(w2, h1, preferred_element_type=jnp.float32) + b2_ref[...]
    h2 = jnp.maximum(h2, 0.0)                           # (H, tile_n), lane-dense
    if use_bf16_matmul:
        h2 = h2.astype(jnp.bfloat16)

    out = jnp.dot(w3, h2, preferred_element_type=jnp.float32) + b3_ref[...]
    o_ref[...] = out.astype(o_ref.dtype)                # unmasked, lane-dense store


def fc_2d_net_forward(x, params, *, tile_n=None, use_bf16_matmul=False):
    """x: (N, 2) float32. params in native PyTorch layout: w (out, in), b (out,).

    Returns (N, C) logits, matching PyTorch FC_2D_Net.forward.
    """
    N, in_dim = x.shape
    w1, b1 = params["w1"], params["b1"]     # (H, 2),  (H,)
    w2, b2 = params["w2"], params["b2"]     # (H, H),  (H,)
    w3, b3 = params["w3"], params["b3"]     # (C, H),  (C,)
    H = w1.shape[0]
    C = w3.shape[0]

    # Tile choice: per-grid-step overhead ~0.35us and intermediates live in
    # VMEM (not vregs), so favor large tiles; for mid-size batches prefer two
    # balanced "parallel" steps so both v7x TensorCores are used.
    if tile_n is None:
        if N <= 256:
            tile_n = _round_up(max(N, 1), LANE)         # single grid step
        elif N <= 4096:
            tile_n = _round_up(pl.cdiv(N, 2), LANE)     # two balanced steps (v7x)
        else:
            tile_n = 2048                               # large-N streaming tiles
    tile_n = _round_up(tile_n, LANE)
    n_tiles = pl.cdiv(N, tile_n)
    N_pad = n_tiles * tile_n

    # Batch-on-lanes: (N, 2) -> (2, N_pad); rows are contiguous/lane-dense.
    xT = jnp.pad(x.T, ((0, 0), (0, N_pad - N)))

    # Sublane-pad the class dim 4 -> 8 (2x write amplification, unmasked stores)
    # instead of the previous 4 -> 128 lane padding (32x).
    C_pad = _round_up(C, SUBLANE)
    w3p = jnp.pad(w3, ((0, C_pad - C), (0, 0)))
    b3p = jnp.pad(b3, ((0, C_pad - C),))

    b1c = b1.reshape(H, 1)
    b2c = b2.reshape(H, 1)
    b3c = b3p.reshape(C_pad, 1)

    def const_spec(shape):
        # Grid-invariant operand: a single pipeline buffer is enough (fetched
        # once). Fall back gracefully if this jax version lacks pipeline_mode.
        try:
            return pl.BlockSpec(shape, lambda i: (0, 0),
                                pipeline_mode=pl.Buffered(1))
        except (TypeError, AttributeError):
            return pl.BlockSpec(shape, lambda i: (0, 0))

    grid = (n_tiles,)
    sem = ("parallel",) if n_tiles > 1 else ("arbitrary",)

    kernel = functools.partial(mlp_kernel, use_bf16_matmul=use_bf16_matmul)

    outT = pl.pallas_call(
        kernel,
        out_shape=jax.ShapeDtypeStruct((C_pad, N_pad), jnp.float32),
        grid_spec=pltpu.PrefetchScalarGridSpec(
            num_scalar_prefetch=0,
            grid=grid,
            in_specs=[
                pl.BlockSpec((in_dim, tile_n), lambda i: (0, i)),   # xT batch tile
                const_spec((H, in_dim)), const_spec((H, 1)),        # fc1
                const_spec((H, H)), const_spec((H, 1)),             # fc2
                const_spec((C_pad, H)), const_spec((C_pad, 1)),     # fc3 (sublane-padded)
            ],
            out_specs=pl.BlockSpec((C_pad, tile_n), lambda i: (0, i)),
        ),
        compiler_params=pltpu.CompilerParams(
            dimension_semantics=sem,
        ),
    )(xT, w1, b1c, w2, b2c, w3p, b3c)

    # Drop batch/class padding and return in PyTorch's (N, C) convention.
    return outT[:C, :N].T


def init_params(key, hidden_units=64, n_classes=4, in_dim=2):
    """Mimics PyTorch nn.Linear default init: U(-1/sqrt(fan_in), +1/sqrt(fan_in)).
    Weights stored in PyTorch (out, in) layout; biases as (out,) vectors."""
    ks = jax.random.split(key, 6)

    def linear(kw, kb, fan_in, fan_out):
        bound = 1.0 / (fan_in ** 0.5)
        w = jax.random.uniform(kw, (fan_out, fan_in), jnp.float32, -bound, bound)
        b = jax.random.uniform(kb, (fan_out,), jnp.float32, -bound, bound)
        return w, b

    w1, b1 = linear(ks[0], ks[1], in_dim, hidden_units)
    w2, b2 = linear(ks[2], ks[3], hidden_units, hidden_units)
    w3, b3 = linear(ks[4], ks[5], hidden_units, n_classes)
    return {"w1": w1, "b1": b1, "w2": w2, "b2": b2, "w3": w3, "b3": b3}


def reference_forward(x, params):
    hp = jax.lax.Precision.HIGHEST
    h1 = jnp.maximum(jnp.dot(x, params["w1"].T, precision=hp) + params["b1"], 0.0)
    h2 = jnp.maximum(jnp.dot(h1, params["w2"].T, precision=hp) + params["b2"], 0.0)
    return jnp.dot(h2, params["w3"].T, precision=hp) + params["b3"]


if __name__ == "__main__":
    key = jax.random.PRNGKey(0)
    k_param, k_x1, k_x2 = jax.random.split(key, 3)

    hidden_units, n_classes = 64, 4
    params = init_params(k_param, hidden_units=hidden_units, n_classes=n_classes)

    # Small batch of 2-D points: single grid step.
    x_small = jax.random.normal(k_x1, (128, 2), jnp.float32)
    out_small = jax.block_until_ready(fc_2d_net_forward(x_small, params))
    ref_small = reference_forward(x_small, params)
    assert out_small.shape == (128, n_classes)
    assert jnp.allclose(out_small, ref_small, atol=2e-4, rtol=2e-4)

    # Ragged, multi-tile batch: exercises wrapper padding + 2 "parallel" steps.
    x_big = jax.random.normal(k_x2, (300, 2), jnp.float32)
    out_big = jax.block_until_ready(fc_2d_net_forward(x_big, params))
    ref_big = reference_forward(x_big, params)
    assert out_big.shape == (300, n_classes)
    assert jnp.allclose(out_big, ref_big, atol=2e-4, rtol=2e-4)

    print("KERNEL_OK")
</pallas_src>

<mosaic_0001>
module attributes {stable_mosaic.version = 11 : i64} {
  func.func @mlp_kernel(%arg0: i32, %arg1: memref<2x128xf32, #tpu.memory_space<vmem>>, %arg2: memref<64x2xf32, #tpu.memory_space<vmem>>, %arg3: memref<64x1xf32, #tpu.memory_space<vmem>>, %arg4: memref<64x64xf32, #tpu.memory_space<vmem>>, %arg5: memref<64x1xf32, #tpu.memory_space<vmem>>, %arg6: memref<8x64xf32, #tpu.memory_space<vmem>>, %arg7: memref<8x1xf32, #tpu.memory_space<vmem>>, %arg8: memref<8x128xf32, #tpu.memory_space<vmem>>) attributes {dimension_semantics = [#tpu.dimension_semantics<arbitrary>], iteration_bounds = array<i64: 1>, scalar_prefetch = 0 : i64, scratch_operands = 0 : i64, tpu.core_type = #tpu.core_type<tc>, window_params = [{transform_indices = @transform_0, window_bounds = array<i64: 2, 128>}, {pipeline_mode = #tpu.pipeline_mode<synchronous>, transform_indices = @transform_1, window_bounds = array<i64: 64, 2>}, {pipeline_mode = #tpu.pipeline_mode<synchronous>, transform_indices = @transform_2, window_bounds = array<i64: 64, 1>}, {pipeline_mode = #tpu.pipeline_mode<synchronous>, transform_indices = @transform_3, window_bounds = array<i64: 64, 64>}, {pipeline_mode = #tpu.pipeline_mode<synchronous>, transform_indices = @transform_4, window_bounds = array<i64: 64, 1>}, {pipeline_mode = #tpu.pipeline_mode<synchronous>, transform_indices = @transform_5, window_bounds = array<i64: 8, 64>}, {pipeline_mode = #tpu.pipeline_mode<synchronous>, transform_indices = @transform_6, window_bounds = array<i64: 8, 1>}, {transform_indices = @transform_7, window_bounds = array<i64: 8, 128>}]} {
    %c0 = arith.constant 0 : index
    %c0_0 = arith.constant 0 : index
    %0 = vector.load %arg1[%c0, %c0_0] : memref<2x128xf32, #tpu.memory_space<vmem>>, vector<2x128xf32>
    %c0_1 = arith.constant 0 : index
    %c0_2 = arith.constant 0 : index
    %1 = vector.load %arg2[%c0_1, %c0_2] : memref<64x2xf32, #tpu.memory_space<vmem>>, vector<64x2xf32>
    %2 = vector.extract_strided_slice %1 {offsets = [0, 0], sizes = [64, 1], strides = [1, 1]} : vector<64x2xf32> to vector<64x1xf32>
    %3 = vector.extract_strided_slice %0 {offsets = [0, 0], sizes = [1, 128], strides = [1, 1]} : vector<2x128xf32> to vector<1x128xf32>
    %4 = vector.broadcast %2 : vector<64x1xf32> to vector<64x128xf32>
    %5 = vector.broadcast %3 : vector<1x128xf32> to vector<64x128xf32>
    %6 = arith.mulf %4, %5 : vector<64x128xf32>
    %7 = vector.extract_strided_slice %1 {offsets = [0, 1], sizes = [64, 1], strides = [1, 1]} : vector<64x2xf32> to vector<64x1xf32>
    %8 = vector.extract_strided_slice %0 {offsets = [1, 0], sizes = [1, 128], strides = [1, 1]} : vector<2x128xf32> to vector<1x128xf32>
    %9 = vector.broadcast %7 : vector<64x1xf32> to vector<64x128xf32>
    %10 = vector.broadcast %8 : vector<1x128xf32> to vector<64x128xf32>
    %11 = arith.mulf %9, %10 : vector<64x128xf32>
    %12 = arith.addf %6, %11 : vector<64x128xf32>
    %c0_3 = arith.constant 0 : index
    %c0_4 = arith.constant 0 : index
    %13 = vector.load %arg3[%c0_3, %c0_4] : memref<64x1xf32, #tpu.memory_space<vmem>>, vector<64x1xf32>
    %14 = vector.broadcast %13 : vector<64x1xf32> to vector<64x128xf32>
    %15 = arith.addf %12, %14 : vector<64x128xf32>
    %cst = arith.constant 0.000000e+00 : f32
    %16 = vector.broadcast %cst : f32 to vector<64x128xf32>
    %17 = arith.maximumf %15, %16 : vector<64x128xf32>
    %c0_5 = arith.constant 0 : index
    %c0_6 = arith.constant 0 : index
    %18 = vector.load %arg4[%c0_5, %c0_6] : memref<64x64xf32, #tpu.memory_space<vmem>>, vector<64x64xf32>
    %c0_7 = arith.constant 0 : index
    %c0_8 = arith.constant 0 : index
    %19 = vector.load %arg6[%c0_7, %c0_8] : memref<8x64xf32, #tpu.memory_space<vmem>>, vector<8x64xf32>
    %cst_9 = arith.constant dense<0.000000e+00> : vector<64x128xf32>
    %20 = tpu.matmul %18, %17, %cst_9 {dimension_numbers = #tpu.dot_dimension_numbers<[1], [0], [0], [1], [0, 0, 1, 1], [], []>} : vector<64x64xf32>, vector<64x128xf32>, vector<64x128xf32> -> vector<64x128xf32>
    %c0_10 = arith.constant 0 : index
    %c0_11 = arith.constant 0 : index
    %21 = vector.load %arg5[%c0_10, %c0_11] : memref<64x1xf32, #tpu.memory_space<vmem>>, vector<64x1xf32>
    %22 = vector.broadcast %21 : vector<64x1xf32> to vector<64x128xf32>
    %23 = arith.addf %20, %22 : vector<64x128xf32>
    %cst_12 = arith.constant 0.000000e+00 : f32
    %24 = vector.broadcast %cst_12 : f32 to vector<64x128xf32>
    %25 = arith.maximumf %23, %24 : vector<64x128xf32>
    %cst_13 = arith.constant dense<0.000000e+00> : vector<8x128xf32>
    %26 = tpu.matmul %19, %25, %cst_13 {dimension_numbers = #tpu.dot_dimension_numbers<[1], [0], [0], [1], [0, 0, 1, 1], [], []>} : vector<8x64xf32>, vector<64x128xf32>, vector<8x128xf32> -> vector<8x128xf32>
    %c0_14 = arith.constant 0 : index
    %c0_15 = arith.constant 0 : index
    %27 = vector.load %arg7[%c0_14, %c0_15] : memref<8x1xf32, #tpu.memory_space<vmem>>, vector<8x1xf32>
    %28 = vector.broadcast %27 : vector<8x1xf32> to vector<8x128xf32>
    %29 = arith.addf %26, %28 : vector<8x128xf32>
    %c0_16 = arith.constant 0 : index
    %c0_17 = arith.constant 0 : index
    %30 = vector.load %arg8[%c0_16, %c0_17] : memref<8x128xf32, #tpu.memory_space<vmem>>, vector<8x128xf32>
    tpu.vector_store %arg8[%c0_16, %c0_17], %29 {strides = array<i32>} : memref<8x128xf32, #tpu.memory_space<vmem>>, vector<8x128xf32>,
    return
  }
  func.func @transform_0(%arg0: i32) -> (i32, i32) {
    %c0_i32 = arith.constant 0 : i32
    %c0_i32_0 = arith.constant 0 : i32
    return %c0_i32, %arg0 : i32, i32
  }
  func.func @transform_1(%arg0: i32) -> (i32, i32) {
    %c0_i32 = arith.constant 0 : i32
    %c0_i32_0 = arith.constant 0 : i32
    %c0_i32_1 = arith.constant 0 : i32
    return %c0_i32, %c0_i32_0 : i32, i32
  }
  func.func @transform_2(%arg0: i32) -> (i32, i32) {
    %c0_i32 = arith.constant 0 : i32
    %c0_i32_0 = arith.constant 0 : i32
    %c0_i32_1 = arith.constant 0 : i32
    return %c0_i32, %c0_i32_0 : i32, i32
  }
  func.func @transform_3(%arg0: i32) -> (i32, i32) {
    %c0_i32 = arith.constant 0 : i32
    %c0_i32_0 = arith.constant 0 : i32
    %c0_i32_1 = arith.constant 0 : i32
    return %c0_i32, %c0_i32_0 : i32, i32
  }
  func.func @transform_4(%arg0: i32) -> (i32, i32) {
    %c0_i32 = arith.constant 0 : i32
    %c0_i32_0 = arith.constant 0 : i32
    %c0_i32_1 = arith.constant 0 : i32
    return %c0_i32, %c0_i32_0 : i32, i32
  }
  func.func @transform_5(%arg0: i32) -> (i32, i32) {
    %c0_i32 = arith.constant 0 : i32
    %c0_i32_0 = arith.constant 0 : i32
    %c0_i32_1 = arith.constant 0 : i32
    return %c0_i32, %c0_i32_0 : i32, i32
  }
  func.func @transform_6(%arg0: i32) -> (i32, i32) {
    %c0_i32 = arith.constant 0 : i32
    %c0_i32_0 = arith.constant 0 : i32
    %c0_i32_1 = arith.constant 0 : i32
    return %c0_i32, %c0_i32_0 : i32, i32
  }
  func.func @transform_7(%arg0: i32) -> (i32, i32) {
    %c0_i32 = arith.constant 0 : i32
    %c0_i32_0 = arith.constant 0 : i32
    return %c0_i32, %arg0 : i32, i32
  }
}

</mosaic_0001>

<bundles_post_ra>
// kernel: tpu_custom_call.1
= control target key start
LH: loop header
LB: loop body
LE: loop exit
PB: predicated region body
PF: predicated region fallthrough
CT: control target
= control target key end

     0   :  { %v642_v2 = vmov 1   ;;  %s814_s0 = inlined_call_operand.vmem [shape: f32[2,128], index: 0, kind: input, shape index: {}]   ;;  %s815_s1 = inlined_call_operand.vmem [shape: f32[64,2], index: 1, kind: input, shape index: {}]   ;;  %s816_s2 = inlined_call_operand.vmem [shape: f32[64,1], index: 2, kind: input, shape index: {}]   ;;  %s817_s3 = inlined_call_operand.vmem [shape: f32[64,64], index: 3, kind: input, shape index: {}]   ;;  %s818_s4 = inlined_call_operand.vmem [shape: f32[64,1], index: 4, kind: input, shape index: {}]   ;;  %s819_s5 = inlined_call_operand.vmem [shape: f32[8,64], index: 5, kind: input, shape index: {}]   ;;  %s820_s6 = inlined_call_operand.vmem [shape: f32[8,1], index: 6, kind: input, shape index: {}]   ;;  %s821_s7 = inlined_call_operand.hbm [shape: f32[8,128], index: 7, kind: output, shape index: {}]  }
   0x1   :  { %v30_v0 = vld [vmem:[%s815_s1 + $0x10] sm:$0xff]  ;;  %v28_v1 = vld [vmem:[%s815_s1] sm:$0xff]  ;;  %610 = vset.pattern.permute.xlu0 %v642_v2  ;;  %608 = vset.pattern.permute.xlu1 %v642_v2  ;;  %v29_v4 = vld [vmem:[%s815_s1 + $0x8] sm:$0xff] }
   0x2   :  { %97 = vperm.xlu0 %610, %v30_v0   ;;  %89 = vperm.xlu1 %608, %v28_v1   ;;  %v32_v3 = vld [vmem:[%s815_s1 + $0x20] sm:$0xff]  ;;  %v34_v5 = vld [vmem:[%s815_s1 + $0x30] sm:$0xff]  ;;  %v31_v6 = vld [vmem:[%s815_s1 + $0x18] sm:$0xff] }
   0x6   :  { %105 = vperm.xlu0 %610, %v32_v3   ;;  %93 = vperm.xlu1 %608, %v29_v4  }
   0x7   :  { %12 = vsyncpa [#allocation3], 0  ;;  %v643_v7 = vmov 0   ;;  %v140_v8 = vld [vmem:[%s816_s2] sm:$0xff]  ;;  %v141_v9 = vld [vmem:[%s816_s2 + $0x8] sm:$0xff]  ;;  %vm261_vm0 = vcmask 523264   ;;  %v76_v30 = vlaneseq }
   0x8   :  { %v33_v10 = vld [vmem:[%s815_s1 + $0x28] sm:$0xff]  ;;  %v143_v11 = vld [vmem:[%s816_s2 + $0x18] sm:$0xff]  ;;  %v213_v13 = vld [vmem:[%s818_s4] sm:$0xff]  ;;  %vm645_vm1 = vmmov 0   ;;  %s647_s18 = smov [#allocation2]  }
   0x9   :  { %v145_v12 = vld [vmem:[%s816_s2 + $0x28] sm:$0xff]  ;;  %v142_v14 = vld [vmem:[%s816_s2 + $0x10] sm:$0xff]  ;;  %v217_v16 = vld [vmem:[%s818_s4 + $0x20] sm:$0xff]  ;;  %v77_v33 = vshrl.u32 %v76_v30, 7  ;;  %s485_s19 = sshll.u32 %s647_s18, 4  ;;  %s486_s19 = int_to_ptr.vmem [resolvable:$true] %s485_s19 }
   0xa   :  { %113 = vperm.xlu0 %610, %v34_v5   ;;  %609 = vset.pattern.permute.xlu1 %v643_v7  ;;  %v215_v15 = vld [vmem:[%s818_s4 + $0x10] sm:$0xff]  ;;  %v35_v17 = vld [vmem:[%s815_s1 + $0x38] sm:$0xff]  ;;  %v399_v19 = vld [vmem:[%s820_s6] sm:$0xff]  ;;  %s618_s20 = scalar_lea.vmem %s486_s19, 128  ;;  %p623_p1 = scmp.lt.s32.totalorder %s486_s19, %s486_s19 }
   0xb   :  { %53 = vperm.xlu1 %609, %v31_v6   ;;  %v219_v18 = vld [vmem:[%s818_s4 + $0x30] sm:$0xff]  ;;  %v144_v20 = vld [vmem:[%s816_s2 + $0x20] sm:$0xff]  ;;  %v147_v22 = vld [vmem:[%s816_s2 + $0x38] sm:$0xff]  ;;  %v122_v36 = vsub.s32 1, %v77_v33  ;;  %v78_v37 = vsub.s32 0, %v77_v33  ;;  %p619_p0 = scmp.ne.s32.totalorder %s486_s19, %s618_s20  ;;  %p624_p2 = scmp.lt.s32.totalorder %s618_s20, %s618_s20 }
   0xc   :  { %v146_v21 = vld [vmem:[%s816_s2 + $0x30] sm:$0xff]  ;;  %v214_v23 = vld [vmem:[%s818_s4 + $0x8] sm:$0xff]  ;;  %v216_v24 = vld [vmem:[%s818_s4 + $0x18] sm:$0xff] }
   0xd   :  { %v204_v25 = vld [vmem:[%s817_s3] sm:$0xff]  ;;  %v218_v26 = vld [vmem:[%s818_s4 + $0x28] sm:$0xff]  ;;  %v220_v27 = vld [vmem:[%s818_s4 + $0x38] sm:$0xff]  ;;  %p625_p3 = por %p624_p2, %p623_p1 }
   0xe   :  { %615 = vset.pattern.permute.xlu0 %v643_v7  ;;  %543 = vmatprep.mubr.msk.f32.mxu0 %vm261_vm0, %v204_v25  ;;  %v27_v38 = vld [vmem:[%s814_s0] sm:$0x3] }
   0xf   :  { %38 = vperm.xlu0 %615, %v28_v1   ;;  %611 = vset.pattern.permute.xlu1 %v642_v2  ;;  %v123_v41 = vrot.slane %v27_v38, %v122_v36  ;;  %v79_v42 = vrot.slane %v27_v38, %v78_v37  ;;  %p626_p4 = pnand %p625_p3, %p619_p0 }
  0x10   :  { %101 = vperm.xlu1 %611, %v31_v6  }
  0x13   :  { %43 = vperm.xlu0 %615, %v29_v4  }
  0x14   :  { %612 = vset.pattern.permute.xlu1 %v643_v7 }
  0x15   :  { %150 = vperm.xlu1 %612, %v140_v8  }
  0x17   :  { %48 = vperm.xlu0 %615, %v30_v0  }
  0x19   :  { %58 = vperm.xlu1 %612, %v32_v3  }
  0x1b   :  { %155 = vperm.xlu0 %615, %v141_v9  }
  0x1d   :  { %63 = vperm.xlu1 %612, %v33_v10  }
  0x1f   :  { %165 = vperm.xlu0 %615, %v143_v11  }
  0x21   :  { %613 = vset.pattern.permute.xlu1 %v642_v2 }
  0x22   :  { %109 = vperm.xlu1 %613, %v33_v10  }
  0x23   :  { %175 = vperm.xlu0 %615, %v145_v12  }
  0x26   :  { %614 = vset.pattern.permute.xlu1 %v643_v7 }
  0x27   :  { %223 = vperm.xlu0 %615, %v213_v13   ;;  %160 = vperm.xlu1 %614, %v142_v14  }
  0x2b   :  { %233 = vperm.xlu0 %615, %v215_v15   ;;  %68 = vperm.xlu1 %614, %v34_v5  }
  0x2f   :  { %243 = vperm.xlu0 %615, %v217_v16   ;;  %73 = vperm.xlu1 %614, %v35_v17  }
  0x33   :  { %253 = vperm.xlu0 %615, %v219_v18   ;;  %616 = vset.pattern.permute.xlu1 %v642_v2 }
  0x34   :  { %117 = vperm.xlu1 %616, %v35_v17  }
  0x37   :  { %402 = vperm.xlu0 %615, %v399_v19  }
  0x38   :  { %617 = vset.pattern.permute.xlu1 %v643_v7 }
  0x39   :  { %170 = vperm.xlu1 %617, %v144_v20  }
  0x3d   :  { %180 = vperm.xlu1 %617, %v146_v21  }
  0x41   :  { %185 = vperm.xlu1 %617, %v147_v22  }
  0x45   :  { %228 = vperm.xlu1 %617, %v214_v23  }
  0x49   :  { %238 = vperm.xlu1 %617, %v216_v24  }
  0x4d   :  { %248 = vperm.xlu1 %617, %v218_v26  }
  0x51   :  { %258 = vperm.xlu1 %617, %v220_v27  }
  0x81   :  { %v90_v28 = vpop.permute.xlu1 %89  ;;  %v98_v29 = vpop.permute.xlu0 %97 }
  0x82   :  { %v124_v46 = vmul.f32 %v123_v41, %v90_v28  ;;  %v126_v61 = vmul.f32 %v123_v41, %v98_v29 }
  0x85   :  { %v94_v31 = vpop.permute.xlu1 %93  ;;  %v106_v32 = vpop.permute.xlu0 %105 }
  0x86   :  { %v125_v49 = vmul.f32 %v123_v41, %v94_v31  ;;  %v128_v14 = vmul.f32 %v123_v41, %v106_v32 }
  0x89   :  { %v114_v34 = vpop.permute.xlu0 %113 }
  0x8a   :  { %v54_v35 = vpop.permute.xlu1 %53  ;;  %v130_v24 = vmul.f32 %v123_v41, %v114_v34  ;;  %v205_v34 = vld [vmem:[%s817_s3 + $0x8] sm:$0xff] }
  0x8b   :  { %v83_v62 = vmul.f32 %v79_v42, %v54_v35 }
  0x8e   :  { %v39_v39 = vpop.permute.xlu0 %38 }
  0x8f   :  { %v102_v40 = vpop.permute.xlu1 %101  ;;  %v80_v44 = vmul.f32 %v79_v42, %v39_v39 }
  0x90   :  { %v127_v59 = vmul.f32 %v123_v41, %v102_v40  ;;  %v206_v40 = vld [vmem:[%s817_s3 + $0x10] sm:$0xff] }
  0x91   :  { %v132_v50 = vadd.f32 %v124_v46, %v80_v44  ;;  %v210_v44 = vld [vmem:[%s817_s3 + $0x30] sm:$0xff]  ;;  %v644_v46 = vmov 0.0|0.0  }
  0x92   :  { %v44_v43 = vpop.permute.xlu0 %43  ;;  %v135_v2 = vadd.f32 %v127_v59, %v83_v62  ;;  %590 = vmatprep.subr.bf16.mxu1 %v644_v46 }
  0x93   :  { %v81_v47 = vmul.f32 %v79_v42, %v44_v43  ;;  %v209_v43 = vld [vmem:[%s817_s3 + $0x28] sm:$0xff] }
  0x94   :  { %v151_v45 = vpop.permute.xlu1 %150 }
  0x95   :  { %v188_v52 = vadd.f32 %v151_v45, %v132_v50  ;;  %v133_v53 = vadd.f32 %v125_v49, %v81_v47  ;;  %v211_v45 = vld [vmem:[%s817_s3 + $0x38] sm:$0xff]  ;;  %v646_v47 = vmov 0.0  }
  0x96   :  { %v49_v48 = vpop.permute.xlu0 %48  ;;  %571 = vmatprep.mubr.msk.f32.mxu1 %vm645_vm1, %v646_v47 }
  0x97   :  { %v196_v57 = vmax.f32 %v188_v52, 0.0  ;;  %v82_v63 = vmul.f32 %v79_v42, %v49_v48 }
  0x98   :  { %v59_v51 = vpop.permute.xlu1 %58 }
  0x99   :  { %v134_v4 = vadd.f32 %v126_v61, %v82_v63  ;;  %v84_v15 = vmul.f32 %v79_v42, %v59_v51 }
  0x9a   :  { %v156_v54 = vpop.permute.xlu0 %155 }
  0x9b   :  { %v189_v55 = vadd.f32 %v156_v54, %v133_v53  ;;  %v136_v20 = vadd.f32 %v128_v14, %v84_v15 }
  0x9c   :  { %v64_v56 = vpop.permute.xlu1 %63 }
  0x9d   :  { %v197_v58 = vmax.f32 %v189_v55, 0.0  ;;  %v85_v13 = vmul.f32 %v79_v42, %v64_v56 }
  0x9e   :  { %v166_v1 = vpop.permute.xlu0 %165 }
  0x9f   :  { %v574_v60 = vpack.c.bf16 %v197_v58, %v196_v57  ;;  %v191_v3 = vadd.f32 %v166_v1, %v135_v2 }
  0xa1   :  { %v110_v0 = vpop.permute.xlu1 %109  ;;  %575 = vmatprep.subr.bf16.mxu0 %v574_v60  ;;  %v199_v7 = vmax.f32 %v191_v3, 0.0 }
  0xa2   :  { %577 = vmatpush3.bf16.msra.mxu0 %v574_v60  ;;  %v129_v12 = vmul.f32 %v123_v41, %v110_v0  ;;  %v176_v18 = vpop.permute.xlu0 %175 }
  0xa4   :  { %v137_v16 = vadd.f32 %v129_v12, %v85_v13 }
  0xa6   :  { %v161_v5 = vpop.permute.xlu1 %160  ;;  %v193_v19 = vadd.f32 %v176_v18, %v137_v16  ;;  %v224_v49 = vpop.permute.xlu0 %223 }
  0xa7   :  { %v190_v6 = vadd.f32 %v161_v5, %v134_v4 }
  0xa8   :  { %v201_v25 = vmax.f32 %v193_v19, 0.0 }
  0xa9   :  { %v198_v8 = vmax.f32 %v190_v6, 0.0 }
  0xaa   :  { %v69_v9 = vpop.permute.xlu1 %68  ;;  %v234_v52 = vpop.permute.xlu0 %233 }
  0xab   :  { %v578_v10 = vpack.c.bf16 %v199_v7, %v198_v8  ;;  %v86_v22 = vmul.f32 %v79_v42, %v69_v9 }
  0xad   :  { %579 = vmatprep.subr.bf16.mxu0 %v578_v10  ;;  %v138_v31 = vadd.f32 %v130_v24, %v86_v22 }
  0xae   :  { %v74_v11 = vpop.permute.xlu1 %73  ;;  %581 = vmatpush3.bf16.msra.mxu0 %v578_v10  ;;  %v244_v0 = vpop.permute.xlu0 %243 }
  0xaf   :  { %v87_v29 = vmul.f32 %v79_v42, %v74_v11  ;;  %v208_v42 = vld [vmem:[%s817_s3 + $0x20] sm:$0xff] }
  0xb2   :  { %v254_v12 = vpop.permute.xlu0 %253 }
  0xb3   :  { %v118_v17 = vpop.permute.xlu1 %117 }
  0xb4   :  { %v131_v26 = vmul.f32 %v123_v41, %v118_v17  ;;  %v207_v41 = vld [vmem:[%s817_s3 + $0x18] sm:$0xff] }
  0xb6   :  { %v139_v32 = vadd.f32 %v131_v26, %v87_v29 }
  0xb8   :  { %v171_v21 = vpop.permute.xlu1 %170 }
  0xb9   :  { %v192_v23 = vadd.f32 %v171_v21, %v136_v20  ;;  %v212_v20 = vld [vmem:[%s819_s5] sm:$0xff]  ;;  %v403_v21 = vpop.permute.xlu0 %402 }
  0xbb   :  { %v200_v27 = vmax.f32 %v192_v23, 0.0 }
  0xbc   :  { %v181_v28 = vpop.permute.xlu1 %180 }
  0xbd   :  { %v582_v30 = vpack.c.bf16 %v201_v25, %v200_v27  ;;  %v194_v33 = vadd.f32 %v181_v28, %v138_v31 }
  0xbf   :  { %583 = vmatprep.subr.bf16.mxu0 %v582_v30  ;;  %v202_v37 = vmax.f32 %v194_v33, 0.0 }
  0xc0   :  { %v186_v35 = vpop.permute.xlu1 %185  ;;  %585 = vmatpush3.bf16.msra.mxu0 %v582_v30 }
  0xc1   :  { %v195_v36 = vadd.f32 %v186_v35, %v139_v32 }
  0xc3   :  { %v203_v38 = vmax.f32 %v195_v36, 0.0 }
  0xc4   :  { %v229_v48 = vpop.permute.xlu1 %228 }
  0xc5   :  { %v586_v39 = vpack.c.bf16 %v203_v38, %v202_v37 }
  0xc7   :  { %587 = vmatprep.subr.bf16.mxu0 %v586_v39 }
  0xc8   :  { %589 = vmatpush3.bf16.msra.mxu0 %v586_v39  ;;  %v239_v50 = vpop.permute.xlu1 %238 }
  0xcb   :  { %544 = vmatmul.mubr.msk.f32.vlgmr.msra.gmra.mrb[0].mxu0 %vm261_vm0, %v205_v34 }
  0xcc   :  { %546 = vmatprep.mubr.msk.f32.mxu0 %vm261_vm0, %v206_v40  ;;  %v249_v61 = vpop.permute.xlu1 %248 }
  0xcf   :  { %547 = vmatmul.mubr.msk.f32.gmra.mrb[2].mxu0 %vm261_vm0, %v207_v41 }
  0xd0   :  { %549 = vmatprep.mubr.msk.f32.mxu0 %vm261_vm0, %v208_v42  ;;  %v259_v9 = vpop.permute.xlu1 %258 }
  0xd3   :  { %550 = vmatmul.mubr.msk.f32.gmra.mrb[4].mxu0 %vm261_vm0, %v209_v43 }
  0xd4   :  { %552 = vmatprep.mubr.msk.f32.mxu0 %vm261_vm0, %v210_v44 }
  0xd7   :  { %553 = vmatmul.mubr.msk.f32.gmra.mrb[6].mxu0 %vm261_vm0, %v211_v45 }
 0x19e   :  { %v545_v51 = vpop.f32.mrb[0].mxu0 }
 0x19f   :  { %v358_v53 = vadd.f32 %v545_v51, %v229_v48  ;;  %v352_v54 = vpop.f32.mrb[1].mxu0 }
 0x1a0   :  { %v353_v55 = vadd.f32 %v352_v54, %v224_v49 }
 0x1a1   :  { %v392_v56 = vmax.f32 %v358_v53, 0.0 }
 0x1a2   :  { %v391_v57 = vmax.f32 %v353_v55, 0.0  ;;  %v548_v58 = vpop.f32.mrb[2].mxu0 }
 0x1a3   :  { %v368_v59 = vadd.f32 %v548_v58, %v239_v50  ;;  %v362_v60 = vpop.f32.mrb[3].mxu0 }
 0x1a4   :  { %v363_v62 = vadd.f32 %v362_v60, %v234_v52  ;;  %v591_v63 = vpack.c.bf16 %v392_v56, %v391_v57 }
 0x1a5   :  { %v394_v1 = vmax.f32 %v368_v59, 0.0 }
 0x1a6   :  { %v393_v2 = vmax.f32 %v363_v62, 0.0  ;;  %v551_v3 = vpop.f32.mrb[4].mxu0  ;;  %592 = vmatpush3.bf16.msra.mxu1 %v591_v63 }
 0x1a7   :  { %v378_v4 = vadd.f32 %v551_v3, %v249_v61  ;;  %v372_v5 = vpop.f32.mrb[5].mxu0  ;;  %593 = vmatprep.subr.bf16.mxu1 %v644_v46 }
 0x1a8   :  { %v594_v6 = vpack.c.bf16 %v394_v1, %v393_v2  ;;  %v373_v7 = vadd.f32 %v372_v5, %v244_v0 }
 0x1a9   :  { %v396_v8 = vmax.f32 %v378_v4, 0.0 }
 0x1aa   :  { %v395_v10 = vmax.f32 %v373_v7, 0.0  ;;  %v554_v11 = vpop.f32.mrb[6].mxu0  ;;  %595 = vmatpush3.bf16.msra.mxu1 %v594_v6 }
 0x1ab   :  { %v388_v13 = vadd.f32 %v554_v11, %v259_v9  ;;  %v382_v14 = vpop.f32.mrb[7].mxu0  ;;  %596 = vmatprep.subr.bf16.mxu1 %v644_v46 }
 0x1ac   :  { %v597_v15 = vpack.c.bf16 %v396_v8, %v395_v10  ;;  %v383_v16 = vadd.f32 %v382_v14, %v254_v12 }
 0x1ad   :  { %v398_v17 = vmax.f32 %v388_v13, 0.0 }
 0x1ae   :  { %v397_v18 = vmax.f32 %v383_v16, 0.0  ;;  %598 = vmatpush3.bf16.msra.mxu1 %v597_v15 }
 0x1af   :  { %599 = vmatprep.subr.bf16.mxu1 %v644_v46 }
 0x1b0   :  { %v600_v19 = vpack.c.bf16 %v398_v17, %v397_v18 }
 0x1b2   :  { %601 = vmatpush3.bf16.msra.mxu1 %v600_v19 }
 0x1b5   :  { %572 = vmatmul.mubr.msk.f32.vlgmr.msra.gmra.mrb[0].mxu1 %vm261_vm0, %v212_v20 }
 0x288   :  { %v474_v22 = vpop.f32.mrb[0].mxu1 }
 0x289   :  { %v475_v23 = vadd.f32 %v474_v22, %v403_v21  ;;  %v573_v24 = vpop.f32.mrb[1].mxu1 }
 0x28b   :  { %478 = vst [vmem:[#allocation2] sm:$0xff] %v475_v23 }
 0x28c   :  { %629 = shalt.err (!%p626_p4)
}
 0x28d   :  { %s630_s5 = scalar_lea.hbm %s821_s7, 128 }
 0x28e   :  { %p631_p5 = scmp.ne.s32.totalorder %s821_s7, %s630_s5  ;;  %p634_p6 = scmp.lt.u32.totalorder %s630_s5, %s821_s7 }
 0x290   :  { %p636_p7 = pnand %p634_p6, %p631_p5 }
 0x292   :  { %639 = shalt.err (!%p636_p7)
}
 0x293   :  { %488 = dma.vmem_to_hbm [thread:$0]  %s486_s19, 128, %s821_s7, [#allocation3]  }
 0x294   :  { %640 = dma.done.wait [#allocation3], 128  }
 0x295   :  { %641 = vsyncadd [#allocation3], 4294967168 }
 0x296   :  { %492 = vsyncpa [#allocation3], 1 }

</bundles_post_ra>
